<compile_context>
chip_gen: v7x
topology: tpu7x:2x2x1
jax: 0.10.0
libtpu: 0.0.40
codegen_flags: <defaults>
</compile_context>

<pallas_src>
import functools

import jax
import jax.numpy as jnp
from jax.experimental import pallas as pl
from jax.experimental.pallas import tpu as pltpu

LAMBDA_CLASS = 1.0
LAMBDA_NOOBJ = 10.0
LAMBDA_OBJ = 1.0
LAMBDA_BOX = 10.0

LANE = 128


def _round_up(x, m):
    return ((x + m - 1) // m) * m


def _make_kernel(n_class, n_chunk, rc):
    """Build the kernel for C classes, n_chunk inner chunks of rc rows each."""

    def kernel(pred_ref, targ_ref, anc_ref, out_ref):
        # pred_ref: (5+C, 1, BR, 128) VMEM, feature-major, cells on sublane/lane
        # targ_ref: (6,   1, BR, 128) VMEM
        # anc_ref:  (1, 2, 128) VMEM   row 0 = anchor_w, row 1 = anchor_h
        # out_ref:  (1, 1, 48, 128)    six (8,128) partial-sum slabs
        aw = anc_ref[0, 0:1, :]            # (1, 128)
        ah = anc_ref[0, 1:2, :]            # (1, 128)
        inv_aw = 1.0 / aw
        inv_ah = 1.0 / ah

        def fold(x):                        # (rc, 128) -> (8, 128), pure VALU adds
            acc = x[0:8]
            for j in range(1, rc // 8):
                acc = acc + x[8 * j:8 * (j + 1)]
            return acc

        def body(ci, carry):
            nb_s, nb_c, ob_s, ob_c, bx_s, ce_s = carry
            r0 = pl.multiple_of(ci * rc, 8)

            def P(ch):                      # (rc, 128) lane-dense feature chunk
                return pred_ref[ch, 0, pl.ds(r0, rc), :]

            def T(ch):
                return targ_ref[ch, 0, pl.ds(r0, rc), :]

            t_obj = T(0)
            objf = (t_obj == 1.0).astype(jnp.float32)
            noobjf = (t_obj == 0.0).astype(jnp.float32)

            # ---- no-object loss: BCE-with-logits on the objectness channel ----
            p_obj = P(0)
            bce = (jnp.maximum(p_obj, 0.0) - p_obj * t_obj
                   + jnp.log(1.0 + jnp.exp(-jnp.abs(p_obj))))

            # ---- decoded boxes (midpoint) and IoU vs. target boxes ----
            bx = jax.nn.sigmoid(P(1))
            by = jax.nn.sigmoid(P(2))
            pw = P(3)
            ph = P(4)
            bw = jnp.exp(pw) * aw
            bh = jnp.exp(ph) * ah

            tx = T(1)
            ty = T(2)
            tw = T(3)
            th = T(4)

            ix = jnp.maximum(jnp.minimum(bx + 0.5 * bw, tx + 0.5 * tw)
                             - jnp.maximum(bx - 0.5 * bw, tx - 0.5 * tw), 0.0)
            iy = jnp.maximum(jnp.minimum(by + 0.5 * bh, ty + 0.5 * th)
                             - jnp.maximum(by - 0.5 * bh, ty - 0.5 * th), 0.0)
            inter = ix * iy
            union = jnp.abs(bw * bh) + jnp.abs(tw * th) - inter + 1e-6
            iou = inter * pl.reciprocal(union, approx=True)

            # ---- object loss: MSE(sigmoid(p_obj), iou * t_obj) on obj cells ----
            obj_se = (jax.nn.sigmoid(p_obj) - iou * t_obj) ** 2

            # ---- box loss: MSE over [sig(x), sig(y), w, h] vs transformed tgt ----
            tw_log = jnp.log(1e-16 + tw * inv_aw)
            th_log = jnp.log(1e-16 + th * inv_ah)
            box_se = ((bx - tx) ** 2 + (by - ty) ** 2
                      + (pw - tw_log) ** 2 + (ph - th_log) ** 2)

            # ---- class cross-entropy: lane-dense loop over class channels ----
            label = T(5)
            m = P(5)
            for c in range(1, n_class):
                m = jnp.maximum(m, P(5 + c))
            sum_exp = jnp.zeros_like(m)
            picked = jnp.zeros_like(m)
            for c in range(n_class):
                lc = P(5 + c)
                sum_exp = sum_exp + jnp.exp(lc - m)
                picked = picked + jnp.where(label == float(c), lc, 0.0)
            ce = m + jnp.log(sum_exp) - picked

            return (nb_s + fold(bce * noobjf),
                    nb_c + fold(noobjf),
                    ob_s + fold(obj_se * objf),
                    ob_c + fold(objf),
                    bx_s + fold(box_se * objf),
                    ce_s + fold(ce * objf))

        z = jnp.zeros((8, LANE), jnp.float32)
        nb_s, nb_c, ob_s, ob_c, bx_s, ce_s = jax.lax.fori_loop(
            0, n_chunk, body, (z, z, z, z, z, z))

        out_ref[0, 0, 0:8, :] = nb_s
        out_ref[0, 0, 8:16, :] = nb_c
        out_ref[0, 0, 16:24, :] = ob_s
        out_ref[0, 0, 24:32, :] = ob_c
        out_ref[0, 0, 32:40, :] = bx_s
        out_ref[0, 0, 40:48, :] = ce_s

    return kernel


@functools.partial(jax.jit, static_argnames=("block_rows",))
def yolo_loss(predictions, target, anchors, *, block_rows=512):
    """predictions: (B,3,S,S,5+C); target: (B,3,S,S,6); anchors: (3,2)."""
    B, A, S, S2, F = predictions.shape
    C = F - 5
    M = B * S * S2

    predictions = predictions.astype(jnp.float32)
    target = target.astype(jnp.float32)
    anchors = anchors.astype(jnp.float32)

    # ---- choose padded cell count and per-step tile rows ----
    mr_raw = pl.cdiv(M, LANE)
    if mr_raw <= block_rows:
        BR = _round_up(mr_raw, 8)          # one row-tile covers everything
        Mr = BR
    else:
        BR = block_rows                    # multiple of 8 (and of 32)
        Mr = _round_up(mr_raw, BR)
    Mp = Mr * LANE
    t_steps = Mr // BR
    RC = 32 if BR % 32 == 0 else 8
    n_chunk = BR // RC
    pad = Mp - M

    # ---- feature-major, anchor-major slabs: (F, A, Mp) -> (F, A, Mr, 128) ----
    pred_fm = jnp.transpose(predictions, (4, 1, 0, 2, 3)).reshape(F, A, M)
    if pad:
        pred_fm = jnp.pad(pred_fm, ((0, 0), (0, 0), (0, pad)))
    pred_fm = pred_fm.reshape(F, A, Mr, LANE)

    targ_fm = jnp.transpose(target, (4, 1, 0, 2, 3)).reshape(6, A, M)
    if pad:
        # pad obj flag with -1 ("ignore") so padded cells hit neither mask
        t_obj = jnp.pad(targ_fm[0:1], ((0, 0), (0, 0), (0, pad)),
                        constant_values=-1.0)
        t_rest = jnp.pad(targ_fm[1:6], ((0, 0), (0, 0), (0, pad)))
        targ_fm = jnp.concatenate([t_obj, t_rest], axis=0)
    targ_fm = targ_fm.reshape(6, A, Mr, LANE)

    # tiny per-anchor constant, lane-broadcast: (A, 2, 128)
    anc_vm = jnp.broadcast_to(anchors[:, :, None], (A, 2, LANE))

    kernel = _make_kernel(C, n_chunk, RC)

    out = pl.pallas_call(
        kernel,
        out_shape=jax.ShapeDtypeStruct((A, t_steps, 48, LANE), jnp.float32),
        grid_spec=pltpu.PrefetchScalarGridSpec(
            num_scalar_prefetch=0,
            grid=(A, t_steps),
            in_specs=[
                pl.BlockSpec((F, 1, BR, LANE), lambda a, i: (0, a, i, 0)),
                pl.BlockSpec((6, 1, BR, LANE), lambda a, i: (0, a, i, 0)),
                pl.BlockSpec((1, 2, LANE), lambda a, i: (a, 0, 0)),
            ],
            out_specs=pl.BlockSpec((1, 1, 48, LANE),
                                   lambda a, i: (a, i, 0, 0)),
        ),
        compiler_params=pltpu.CompilerParams(
            dimension_semantics=("parallel", "parallel")),
    )(pred_fm, targ_fm, anc_vm)

    # ---- finalize (tiny): reduce the six (8,128) partials and combine ----
    parts = out.reshape(A, t_steps, 6, 8, LANE).sum(axis=(0, 1, 3, 4))
    noobj_sum, noobj_cnt = parts[0], parts[1]
    obj_sum, obj_cnt = parts[2], parts[3]
    box_sum, ce_sum = parts[4], parts[5]

    no_object_loss = noobj_sum / noobj_cnt
    object_loss = obj_sum / obj_cnt
    box_loss = box_sum / (4.0 * obj_cnt)
    class_loss = ce_sum / obj_cnt
    return (LAMBDA_BOX * box_loss + LAMBDA_OBJ * object_loss
            + LAMBDA_NOOBJ * no_object_loss + LAMBDA_CLASS * class_loss)


def reference_loss(pred, targ, anchors):
    """Plain-JAX reference mirroring the PyTorch forward (masked means)."""
    anc = anchors.reshape(1, 3, 1, 1, 2)
    t0 = targ[..., 0]
    obj = (t0 == 1.0).astype(jnp.float32)
    noobj = (t0 == 0.0).astype(jnp.float32)

    p0 = pred[..., 0]
    bce = jnp.maximum(p0, 0.0) - p0 * t0 + jnp.log1p(jnp.exp(-jnp.abs(p0)))
    no_object_loss = jnp.sum(bce * noobj) / jnp.sum(noobj)

    sig = jax.nn.sigmoid
    bx, by = sig(pred[..., 1]), sig(pred[..., 2])
    bw = jnp.exp(pred[..., 3]) * anc[..., 0]
    bh = jnp.exp(pred[..., 4]) * anc[..., 1]
    tx, ty, tw, th = targ[..., 1], targ[..., 2], targ[..., 3], targ[..., 4]
    ix = jnp.maximum(jnp.minimum(bx + bw / 2, tx + tw / 2)
                     - jnp.maximum(bx - bw / 2, tx - tw / 2), 0.0)
    iy = jnp.maximum(jnp.minimum(by + bh / 2, ty + th / 2)
                     - jnp.maximum(by - bh / 2, ty - th / 2), 0.0)
    inter = ix * iy
    iou = inter / (jnp.abs(bw * bh) + jnp.abs(tw * th) - inter + 1e-6)

    n_obj = jnp.sum(obj)
    object_loss = jnp.sum(((sig(p0) - iou * t0) ** 2) * obj) / n_obj

    tw_log = jnp.log(1e-16 + tw / anc[..., 0])
    th_log = jnp.log(1e-16 + th / anc[..., 1])
    box_se = ((bx - tx) ** 2 + (by - ty) ** 2
              + (pred[..., 3] - tw_log) ** 2 + (pred[..., 4] - th_log) ** 2)
    box_loss = jnp.sum(box_se * obj) / (4.0 * n_obj)

    logits = pred[..., 5:]
    label = targ[..., 5].astype(jnp.int32)
    logz = jax.scipy.special.logsumexp(logits, axis=-1)
    picked = jnp.take_along_axis(logits, label[..., None], axis=-1)[..., 0]
    class_loss = jnp.sum((logz - picked) * obj) / n_obj

    return (LAMBDA_BOX * box_loss + LAMBDA_OBJ * object_loss
            + LAMBDA_NOOBJ * no_object_loss + LAMBDA_CLASS * class_loss)


if __name__ == "__main__":
    B, A, S, C = 2, 3, 16, 8   # cells per anchor = B*S*S = 512, feature dim = 13
    key = jax.random.PRNGKey(0)
    k1, k2, k3, k4, k5 = jax.random.split(key, 5)

    predictions = 0.5 * jax.random.normal(k1, (B, A, S, S, 5 + C), dtype=jnp.float32)

    r = jax.random.uniform(k2, (B, A, S, S))
    t0 = jnp.where(r < 0.15, 1.0, jnp.where(r < 0.9, 0.0, -1.0)).astype(jnp.float32)
    txy = jax.random.uniform(k3, (B, A, S, S, 2), minval=0.05, maxval=0.95)
    twh = jax.random.uniform(k4, (B, A, S, S, 2), minval=0.5, maxval=2.0)
    tcls = jax.random.randint(k5, (B, A, S, S), 0, C).astype(jnp.float32)
    target = jnp.concatenate(
        [t0[..., None], txy, twh, tcls[..., None]], axis=-1).astype(jnp.float32)

    anchors = jnp.array([[0.9, 1.2], [0.7, 0.5], [1.5, 0.8]], dtype=jnp.float32)

    loss = yolo_loss(predictions, target, anchors)
    loss = jax.block_until_ready(loss)

    ref = reference_loss(predictions, target, anchors)
    assert jnp.isfinite(loss), "kernel produced non-finite loss"
    assert jnp.allclose(loss, ref, rtol=1e-3, atol=1e-3), (loss, ref)

    print("KERNEL_OK")
</pallas_src>

<mosaic_0001>
module attributes {stable_mosaic.version = 11 : i64} {
  func.func @kernel(%arg0: i32, %arg1: i32, %arg2: memref<13x1x8x128xf32, #tpu.memory_space<vmem>>, %arg3: memref<6x1x8x128xf32, #tpu.memory_space<vmem>>, %arg4: memref<1x2x128xf32, #tpu.memory_space<vmem>>, %arg5: memref<1x1x48x128xf32, #tpu.memory_space<vmem>>) attributes {dimension_semantics = [#tpu.dimension_semantics<parallel>, #tpu.dimension_semantics<parallel>], iteration_bounds = array<i64: 3, 1>, scalar_prefetch = 0 : i64, scratch_operands = 0 : i64, tpu.core_type = #tpu.core_type<tc>, window_params = [{transform_indices = @transform_0, window_bounds = array<i64: 13, 1, 8, 128>}, {transform_indices = @transform_1, window_bounds = array<i64: 6, 1, 8, 128>}, {transform_indices = @transform_2, window_bounds = array<i64: 1, 2, 128>}, {transform_indices = @transform_3, window_bounds = array<i64: 1, 1, 48, 128>}]} {
    %c0 = arith.constant 0 : index
    %c0_0 = arith.constant 0 : index
    %c0_1 = arith.constant 0 : index
    %0 = vector.load %arg4[%c0, %c0_0, %c0_1] : memref<1x2x128xf32, #tpu.memory_space<vmem>>, vector<1x1x128xf32>
    %1 = vector.shape_cast %0 : vector<1x1x128xf32> to vector<1x128xf32>
    %c0_2 = arith.constant 0 : index
    %c1 = arith.constant 1 : index
    %c0_3 = arith.constant 0 : index
    %2 = vector.load %arg4[%c0_2, %c1, %c0_3] : memref<1x2x128xf32, #tpu.memory_space<vmem>>, vector<1x1x128xf32>
    %3 = vector.shape_cast %2 : vector<1x1x128xf32> to vector<1x128xf32>
    %cst = arith.constant 1.000000e+00 : f32
    %4 = vector.broadcast %cst : f32 to vector<1x128xf32>
    %5 = arith.divf %4, %1 : vector<1x128xf32>
    %cst_4 = arith.constant 1.000000e+00 : f32
    %6 = vector.broadcast %cst_4 : f32 to vector<1x128xf32>
    %7 = arith.divf %6, %3 : vector<1x128xf32>
    %cst_5 = arith.constant 0.000000e+00 : f32
    %8 = vector.broadcast %cst_5 : f32 to vector<8x128xf32>
    %c0_i32 = arith.constant 0 : i32
    %c8_i32 = arith.constant 8 : i32
    %9 = arith.muli %c0_i32, %c8_i32 : i32
    %10 = tpu.assume_multiple %9, 8 : i32
    %c0_6 = arith.constant 0 : index
    %c0_7 = arith.constant 0 : index
    %11 = arith.index_cast %10 : i32 to index
    %c0_8 = arith.constant 0 : index
    %12 = vector.load %arg3[%c0_6, %c0_7, %11, %c0_8] : memref<6x1x8x128xf32, #tpu.memory_space<vmem>>, vector<1x1x8x128xf32>
    %13 = vector.shape_cast %12 : vector<1x1x8x128xf32> to vector<8x128xf32>
    %cst_9 = arith.constant 1.000000e+00 : f32
    %14 = vector.broadcast %cst_9 : f32 to vector<8x128xf32>
    %15 = arith.cmpf oeq, %13, %14 : vector<8x128xf32>
    %16 = arith.extui %15 : vector<8x128xi1> to vector<8x128xi32>
    %17 = arith.sitofp %16 : vector<8x128xi32> to vector<8x128xf32>
    %cst_10 = arith.constant 0.000000e+00 : f32
    %18 = vector.broadcast %cst_10 : f32 to vector<8x128xf32>
    %19 = arith.cmpf oeq, %13, %18 : vector<8x128xf32>
    %20 = arith.extui %19 : vector<8x128xi1> to vector<8x128xi32>
    %21 = arith.sitofp %20 : vector<8x128xi32> to vector<8x128xf32>
    %c0_11 = arith.constant 0 : index
    %c0_12 = arith.constant 0 : index
    %22 = arith.index_cast %10 : i32 to index
    %c0_13 = arith.constant 0 : index
    %23 = vector.load %arg2[%c0_11, %c0_12, %22, %c0_13] : memref<13x1x8x128xf32, #tpu.memory_space<vmem>>, vector<1x1x8x128xf32>
    %24 = vector.shape_cast %23 : vector<1x1x8x128xf32> to vector<8x128xf32>
    %cst_14 = arith.constant 0.000000e+00 : f32
    %25 = vector.broadcast %cst_14 : f32 to vector<8x128xf32>
    %26 = arith.maximumf %24, %25 : vector<8x128xf32>
    %27 = arith.mulf %24, %13 : vector<8x128xf32>
    %28 = arith.subf %26, %27 : vector<8x128xf32>
    %29 = math.absf %24 : vector<8x128xf32>
    %cst_15 = arith.constant 0.000000e+00 : f32
    %30 = vector.broadcast %cst_15 : f32 to vector<8x128xf32>
    %31 = arith.subf %30, %29 : vector<8x128xf32>
    %32 = math.exp %31 : vector<8x128xf32>
    %cst_16 = arith.constant 1.000000e+00 : f32
    %33 = vector.broadcast %cst_16 : f32 to vector<8x128xf32>
    %34 = arith.addf %33, %32 : vector<8x128xf32>
    %35 = math.log %34 : vector<8x128xf32>
    %36 = arith.addf %28, %35 : vector<8x128xf32>
    %c1_17 = arith.constant 1 : index
    %c0_18 = arith.constant 0 : index
    %37 = arith.index_cast %10 : i32 to index
    %c0_19 = arith.constant 0 : index
    %38 = vector.load %arg2[%c1_17, %c0_18, %37, %c0_19] : memref<13x1x8x128xf32, #tpu.memory_space<vmem>>, vector<1x1x8x128xf32>
    %39 = vector.shape_cast %38 : vector<1x1x8x128xf32> to vector<8x128xf32>
    %40 = arith.negf %39 : vector<8x128xf32>
    %41 = math.exp %40 : vector<8x128xf32>
    %cst_20 = arith.constant 1.000000e+00 : f32
    %42 = vector.broadcast %cst_20 : f32 to vector<8x128xf32>
    %43 = arith.addf %42, %41 : vector<8x128xf32>
    %44 = arith.divf %42, %43 : vector<8x128xf32>
    %c2 = arith.constant 2 : index
    %c0_21 = arith.constant 0 : index
    %45 = arith.index_cast %10 : i32 to index
    %c0_22 = arith.constant 0 : index
    %46 = vector.load %arg2[%c2, %c0_21, %45, %c0_22] : memref<13x1x8x128xf32, #tpu.memory_space<vmem>>, vector<1x1x8x128xf32>
    %47 = vector.shape_cast %46 : vector<1x1x8x128xf32> to vector<8x128xf32>
    %48 = arith.negf %47 : vector<8x128xf32>
    %49 = math.exp %48 : vector<8x128xf32>
    %cst_23 = arith.constant 1.000000e+00 : f32
    %50 = vector.broadcast %cst_23 : f32 to vector<8x128xf32>
    %51 = arith.addf %50, %49 : vector<8x128xf32>
    %52 = arith.divf %50, %51 : vector<8x128xf32>
    %c3 = arith.constant 3 : index
    %c0_24 = arith.constant 0 : index
    %53 = arith.index_cast %10 : i32 to index
    %c0_25 = arith.constant 0 : index
    %54 = vector.load %arg2[%c3, %c0_24, %53, %c0_25] : memref<13x1x8x128xf32, #tpu.memory_space<vmem>>, vector<1x1x8x128xf32>
    %55 = vector.shape_cast %54 : vector<1x1x8x128xf32> to vector<8x128xf32>
    %c4 = arith.constant 4 : index
    %c0_26 = arith.constant 0 : index
    %56 = arith.index_cast %10 : i32 to index
    %c0_27 = arith.constant 0 : index
    %57 = vector.load %arg2[%c4, %c0_26, %56, %c0_27] : memref<13x1x8x128xf32, #tpu.memory_space<vmem>>, vector<1x1x8x128xf32>
    %58 = vector.shape_cast %57 : vector<1x1x8x128xf32> to vector<8x128xf32>
    %59 = math.exp %55 : vector<8x128xf32>
    %60 = vector.broadcast %1 : vector<1x128xf32> to vector<8x128xf32>
    %61 = arith.mulf %59, %60 : vector<8x128xf32>
    %62 = math.exp %58 : vector<8x128xf32>
    %63 = vector.broadcast %3 : vector<1x128xf32> to vector<8x128xf32>
    %64 = arith.mulf %62, %63 : vector<8x128xf32>
    %c1_28 = arith.constant 1 : index
    %c0_29 = arith.constant 0 : index
    %65 = arith.index_cast %10 : i32 to index
    %c0_30 = arith.constant 0 : index
    %66 = vector.load %arg3[%c1_28, %c0_29, %65, %c0_30] : memref<6x1x8x128xf32, #tpu.memory_space<vmem>>, vector<1x1x8x128xf32>
    %67 = vector.shape_cast %66 : vector<1x1x8x128xf32> to vector<8x128xf32>
    %c2_31 = arith.constant 2 : index
    %c0_32 = arith.constant 0 : index
    %68 = arith.index_cast %10 : i32 to index
    %c0_33 = arith.constant 0 : index
    %69 = vector.load %arg3[%c2_31, %c0_32, %68, %c0_33] : memref<6x1x8x128xf32, #tpu.memory_space<vmem>>, vector<1x1x8x128xf32>
    %70 = vector.shape_cast %69 : vector<1x1x8x128xf32> to vector<8x128xf32>
    %c3_34 = arith.constant 3 : index
    %c0_35 = arith.constant 0 : index
    %71 = arith.index_cast %10 : i32 to index
    %c0_36 = arith.constant 0 : index
    %72 = vector.load %arg3[%c3_34, %c0_35, %71, %c0_36] : memref<6x1x8x128xf32, #tpu.memory_space<vmem>>, vector<1x1x8x128xf32>
    %73 = vector.shape_cast %72 : vector<1x1x8x128xf32> to vector<8x128xf32>
    %c4_37 = arith.constant 4 : index
    %c0_38 = arith.constant 0 : index
    %74 = arith.index_cast %10 : i32 to index
    %c0_39 = arith.constant 0 : index
    %75 = vector.load %arg3[%c4_37, %c0_38, %74, %c0_39] : memref<6x1x8x128xf32, #tpu.memory_space<vmem>>, vector<1x1x8x128xf32>
    %76 = vector.shape_cast %75 : vector<1x1x8x128xf32> to vector<8x128xf32>
    %cst_40 = arith.constant 5.000000e-01 : f32
    %77 = vector.broadcast %cst_40 : f32 to vector<8x128xf32>
    %78 = arith.mulf %77, %61 : vector<8x128xf32>
    %79 = arith.addf %44, %78 : vector<8x128xf32>
    %cst_41 = arith.constant 5.000000e-01 : f32
    %80 = vector.broadcast %cst_41 : f32 to vector<8x128xf32>
    %81 = arith.mulf %80, %73 : vector<8x128xf32>
    %82 = arith.addf %67, %81 : vector<8x128xf32>
    %83 = arith.minimumf %79, %82 : vector<8x128xf32>
    %cst_42 = arith.constant 5.000000e-01 : f32
    %84 = vector.broadcast %cst_42 : f32 to vector<8x128xf32>
    %85 = arith.mulf %84, %61 : vector<8x128xf32>
    %86 = arith.subf %44, %85 : vector<8x128xf32>
    %cst_43 = arith.constant 5.000000e-01 : f32
    %87 = vector.broadcast %cst_43 : f32 to vector<8x128xf32>
    %88 = arith.mulf %87, %73 : vector<8x128xf32>
    %89 = arith.subf %67, %88 : vector<8x128xf32>
    %90 = arith.maximumf %86, %89 : vector<8x128xf32>
    %91 = arith.subf %83, %90 : vector<8x128xf32>
    %cst_44 = arith.constant 0.000000e+00 : f32
    %92 = vector.broadcast %cst_44 : f32 to vector<8x128xf32>
    %93 = arith.maximumf %91, %92 : vector<8x128xf32>
    %cst_45 = arith.constant 5.000000e-01 : f32
    %94 = vector.broadcast %cst_45 : f32 to vector<8x128xf32>
    %95 = arith.mulf %94, %64 : vector<8x128xf32>
    %96 = arith.addf %52, %95 : vector<8x128xf32>
    %cst_46 = arith.constant 5.000000e-01 : f32
    %97 = vector.broadcast %cst_46 : f32 to vector<8x128xf32>
    %98 = arith.mulf %97, %76 : vector<8x128xf32>
    %99 = arith.addf %70, %98 : vector<8x128xf32>
    %100 = arith.minimumf %96, %99 : vector<8x128xf32>
    %cst_47 = arith.constant 5.000000e-01 : f32
    %101 = vector.broadcast %cst_47 : f32 to vector<8x128xf32>
    %102 = arith.mulf %101, %64 : vector<8x128xf32>
    %103 = arith.subf %52, %102 : vector<8x128xf32>
    %cst_48 = arith.constant 5.000000e-01 : f32
    %104 = vector.broadcast %cst_48 : f32 to vector<8x128xf32>
    %105 = arith.mulf %104, %76 : vector<8x128xf32>
    %106 = arith.subf %70, %105 : vector<8x128xf32>
    %107 = arith.maximumf %103, %106 : vector<8x128xf32>
    %108 = arith.subf %100, %107 : vector<8x128xf32>
    %cst_49 = arith.constant 0.000000e+00 : f32
    %109 = vector.broadcast %cst_49 : f32 to vector<8x128xf32>
    %110 = arith.maximumf %108, %109 : vector<8x128xf32>
    %111 = arith.mulf %93, %110 : vector<8x128xf32>
    %112 = arith.mulf %61, %64 : vector<8x128xf32>
    %113 = math.absf %112 : vector<8x128xf32>
    %114 = arith.mulf %73, %76 : vector<8x128xf32>
    %115 = math.absf %114 : vector<8x128xf32>
    %116 = arith.addf %113, %115 : vector<8x128xf32>
    %117 = arith.subf %116, %111 : vector<8x128xf32>
    %cst_50 = arith.constant 9.99999997E-7 : f32
    %118 = vector.broadcast %cst_50 : f32 to vector<8x128xf32>
    %119 = arith.addf %117, %118 : vector<8x128xf32>
    %120 = tpu.reciprocal %119 {approx = true} : vector<8x128xf32> -> vector<8x128xf32>
    %121 = arith.mulf %111, %120 : vector<8x128xf32>
    %122 = arith.negf %24 : vector<8x128xf32>
    %123 = math.exp %122 : vector<8x128xf32>
    %cst_51 = arith.constant 1.000000e+00 : f32
    %124 = vector.broadcast %cst_51 : f32 to vector<8x128xf32>
    %125 = arith.addf %124, %123 : vector<8x128xf32>
    %126 = arith.divf %124, %125 : vector<8x128xf32>
    %127 = arith.mulf %121, %13 : vector<8x128xf32>
    %128 = arith.subf %126, %127 : vector<8x128xf32>
    %129 = arith.mulf %128, %128 : vector<8x128xf32>
    %130 = vector.broadcast %5 : vector<1x128xf32> to vector<8x128xf32>
    %131 = arith.mulf %73, %130 : vector<8x128xf32>
    %cst_52 = arith.constant 1.000000e-16 : f32
    %132 = vector.broadcast %cst_52 : f32 to vector<8x128xf32>
    %133 = arith.addf %132, %131 : vector<8x128xf32>
    %134 = math.log %133 : vector<8x128xf32>
    %135 = vector.broadcast %7 : vector<1x128xf32> to vector<8x128xf32>
    %136 = arith.mulf %76, %135 : vector<8x128xf32>
    %cst_53 = arith.constant 1.000000e-16 : f32
    %137 = vector.broadcast %cst_53 : f32 to vector<8x128xf32>
    %138 = arith.addf %137, %136 : vector<8x128xf32>
    %139 = math.log %138 : vector<8x128xf32>
    %140 = arith.subf %44, %67 : vector<8x128xf32>
    %141 = arith.mulf %140, %140 : vector<8x128xf32>
    %142 = arith.subf %52, %70 : vector<8x128xf32>
    %143 = arith.mulf %142, %142 : vector<8x128xf32>
    %144 = arith.addf %141, %143 : vector<8x128xf32>
    %145 = arith.subf %55, %134 : vector<8x128xf32>
    %146 = arith.mulf %145, %145 : vector<8x128xf32>
    %147 = arith.addf %144, %146 : vector<8x128xf32>
    %148 = arith.subf %58, %139 : vector<8x128xf32>
    %149 = arith.mulf %148, %148 : vector<8x128xf32>
    %150 = arith.addf %147, %149 : vector<8x128xf32>
    %c5 = arith.constant 5 : index
    %c0_54 = arith.constant 0 : index
    %151 = arith.index_cast %10 : i32 to index
    %c0_55 = arith.constant 0 : index
    %152 = vector.load %arg3[%c5, %c0_54, %151, %c0_55] : memref<6x1x8x128xf32, #tpu.memory_space<vmem>>, vector<1x1x8x128xf32>
    %153 = vector.shape_cast %152 : vector<1x1x8x128xf32> to vector<8x128xf32>
    %c5_56 = arith.constant 5 : index
    %c0_57 = arith.constant 0 : index
    %154 = arith.index_cast %10 : i32 to index
    %c0_58 = arith.constant 0 : index
    %155 = vector.load %arg2[%c5_56, %c0_57, %154, %c0_58] : memref<13x1x8x128xf32, #tpu.memory_space<vmem>>, vector<1x1x8x128xf32>
    %156 = vector.shape_cast %155 : vector<1x1x8x128xf32> to vector<8x128xf32>
    %c6 = arith.constant 6 : index
    %c0_59 = arith.constant 0 : index
    %157 = arith.index_cast %10 : i32 to index
    %c0_60 = arith.constant 0 : index
    %158 = vector.load %arg2[%c6, %c0_59, %157, %c0_60] : memref<13x1x8x128xf32, #tpu.memory_space<vmem>>, vector<1x1x8x128xf32>
    %159 = vector.shape_cast %158 : vector<1x1x8x128xf32> to vector<8x128xf32>
    %160 = arith.maximumf %156, %159 : vector<8x128xf32>
    %c7 = arith.constant 7 : index
    %c0_61 = arith.constant 0 : index
    %161 = arith.index_cast %10 : i32 to index
    %c0_62 = arith.constant 0 : index
    %162 = vector.load %arg2[%c7, %c0_61, %161, %c0_62] : memref<13x1x8x128xf32, #tpu.memory_space<vmem>>, vector<1x1x8x128xf32>
    %163 = vector.shape_cast %162 : vector<1x1x8x128xf32> to vector<8x128xf32>
    %164 = arith.maximumf %160, %163 : vector<8x128xf32>
    %c8 = arith.constant 8 : index
    %c0_63 = arith.constant 0 : index
    %165 = arith.index_cast %10 : i32 to index
    %c0_64 = arith.constant 0 : index
    %166 = vector.load %arg2[%c8, %c0_63, %165, %c0_64] : memref<13x1x8x128xf32, #tpu.memory_space<vmem>>, vector<1x1x8x128xf32>
    %167 = vector.shape_cast %166 : vector<1x1x8x128xf32> to vector<8x128xf32>
    %168 = arith.maximumf %164, %167 : vector<8x128xf32>
    %c9 = arith.constant 9 : index
    %c0_65 = arith.constant 0 : index
    %169 = arith.index_cast %10 : i32 to index
    %c0_66 = arith.constant 0 : index
    %170 = vector.load %arg2[%c9, %c0_65, %169, %c0_66] : memref<13x1x8x128xf32, #tpu.memory_space<vmem>>, vector<1x1x8x128xf32>
    %171 = vector.shape_cast %170 : vector<1x1x8x128xf32> to vector<8x128xf32>
    %172 = arith.maximumf %168, %171 : vector<8x128xf32>
    %c10 = arith.constant 10 : index
    %c0_67 = arith.constant 0 : index
    %173 = arith.index_cast %10 : i32 to index
    %c0_68 = arith.constant 0 : index
    %174 = vector.load %arg2[%c10, %c0_67, %173, %c0_68] : memref<13x1x8x128xf32, #tpu.memory_space<vmem>>, vector<1x1x8x128xf32>
    %175 = vector.shape_cast %174 : vector<1x1x8x128xf32> to vector<8x128xf32>
    %176 = arith.maximumf %172, %175 : vector<8x128xf32>
    %c11 = arith.constant 11 : index
    %c0_69 = arith.constant 0 : index
    %177 = arith.index_cast %10 : i32 to index
    %c0_70 = arith.constant 0 : index
    %178 = vector.load %arg2[%c11, %c0_69, %177, %c0_70] : memref<13x1x8x128xf32, #tpu.memory_space<vmem>>, vector<1x1x8x128xf32>
    %179 = vector.shape_cast %178 : vector<1x1x8x128xf32> to vector<8x128xf32>
    %180 = arith.maximumf %176, %179 : vector<8x128xf32>
    %c12 = arith.constant 12 : index
    %c0_71 = arith.constant 0 : index
    %181 = arith.index_cast %10 : i32 to index
    %c0_72 = arith.constant 0 : index
    %182 = vector.load %arg2[%c12, %c0_71, %181, %c0_72] : memref<13x1x8x128xf32, #tpu.memory_space<vmem>>, vector<1x1x8x128xf32>
    %183 = vector.shape_cast %182 : vector<1x1x8x128xf32> to vector<8x128xf32>
    %184 = arith.maximumf %180, %183 : vector<8x128xf32>
    %cst_73 = arith.constant 0.000000e+00 : f32
    %185 = vector.broadcast %cst_73 : f32 to vector<8x128xf32>
    %cst_74 = arith.constant 0.000000e+00 : f32
    %186 = vector.broadcast %cst_74 : f32 to vector<8x128xf32>
    %c5_75 = arith.constant 5 : index
    %c0_76 = arith.constant 0 : index
    %187 = arith.index_cast %10 : i32 to index
    %c0_77 = arith.constant 0 : index
    %188 = vector.load %arg2[%c5_75, %c0_76, %187, %c0_77] : memref<13x1x8x128xf32, #tpu.memory_space<vmem>>, vector<1x1x8x128xf32>
    %189 = vector.shape_cast %188 : vector<1x1x8x128xf32> to vector<8x128xf32>
    %190 = arith.subf %189, %184 : vector<8x128xf32>
    %191 = math.exp %190 : vector<8x128xf32>
    %192 = arith.addf %185, %191 : vector<8x128xf32>
    %cst_78 = arith.constant 0.000000e+00 : f32
    %193 = vector.broadcast %cst_78 : f32 to vector<8x128xf32>
    %194 = arith.cmpf oeq, %153, %193 : vector<8x128xf32>
    %cst_79 = arith.constant 0.000000e+00 : f32
    %195 = vector.broadcast %cst_79 : f32 to vector<8x128xf32>
    %196 = arith.select %194, %189, %195 : vector<8x128xi1>, vector<8x128xf32>
    %197 = arith.addf %186, %196 : vector<8x128xf32>
    %c6_80 = arith.constant 6 : index
    %c0_81 = arith.constant 0 : index
    %198 = arith.index_cast %10 : i32 to index
    %c0_82 = arith.constant 0 : index
    %199 = vector.load %arg2[%c6_80, %c0_81, %198, %c0_82] : memref<13x1x8x128xf32, #tpu.memory_space<vmem>>, vector<1x1x8x128xf32>
    %200 = vector.shape_cast %199 : vector<1x1x8x128xf32> to vector<8x128xf32>
    %201 = arith.subf %200, %184 : vector<8x128xf32>
    %202 = math.exp %201 : vector<8x128xf32>
    %203 = arith.addf %192, %202 : vector<8x128xf32>
    %cst_83 = arith.constant 1.000000e+00 : f32
    %204 = vector.broadcast %cst_83 : f32 to vector<8x128xf32>
    %205 = arith.cmpf oeq, %153, %204 : vector<8x128xf32>
    %cst_84 = arith.constant 0.000000e+00 : f32
    %206 = vector.broadcast %cst_84 : f32 to vector<8x128xf32>
    %207 = arith.select %205, %200, %206 : vector<8x128xi1>, vector<8x128xf32>
    %208 = arith.addf %197, %207 : vector<8x128xf32>
    %c7_85 = arith.constant 7 : index
    %c0_86 = arith.constant 0 : index
    %209 = arith.index_cast %10 : i32 to index
    %c0_87 = arith.constant 0 : index
    %210 = vector.load %arg2[%c7_85, %c0_86, %209, %c0_87] : memref<13x1x8x128xf32, #tpu.memory_space<vmem>>, vector<1x1x8x128xf32>
    %211 = vector.shape_cast %210 : vector<1x1x8x128xf32> to vector<8x128xf32>
    %212 = arith.subf %211, %184 : vector<8x128xf32>
    %213 = math.exp %212 : vector<8x128xf32>
    %214 = arith.addf %203, %213 : vector<8x128xf32>
    %cst_88 = arith.constant 2.000000e+00 : f32
    %215 = vector.broadcast %cst_88 : f32 to vector<8x128xf32>
    %216 = arith.cmpf oeq, %153, %215 : vector<8x128xf32>
    %cst_89 = arith.constant 0.000000e+00 : f32
    %217 = vector.broadcast %cst_89 : f32 to vector<8x128xf32>
    %218 = arith.select %216, %211, %217 : vector<8x128xi1>, vector<8x128xf32>
    %219 = arith.addf %208, %218 : vector<8x128xf32>
    %c8_90 = arith.constant 8 : index
    %c0_91 = arith.constant 0 : index
    %220 = arith.index_cast %10 : i32 to index
    %c0_92 = arith.constant 0 : index
    %221 = vector.load %arg2[%c8_90, %c0_91, %220, %c0_92] : memref<13x1x8x128xf32, #tpu.memory_space<vmem>>, vector<1x1x8x128xf32>
    %222 = vector.shape_cast %221 : vector<1x1x8x128xf32> to vector<8x128xf32>
    %223 = arith.subf %222, %184 : vector<8x128xf32>
    %224 = math.exp %223 : vector<8x128xf32>
    %225 = arith.addf %214, %224 : vector<8x128xf32>
    %cst_93 = arith.constant 3.000000e+00 : f32
    %226 = vector.broadcast %cst_93 : f32 to vector<8x128xf32>
    %227 = arith.cmpf oeq, %153, %226 : vector<8x128xf32>
    %cst_94 = arith.constant 0.000000e+00 : f32
    %228 = vector.broadcast %cst_94 : f32 to vector<8x128xf32>
    %229 = arith.select %227, %222, %228 : vector<8x128xi1>, vector<8x128xf32>
    %230 = arith.addf %219, %229 : vector<8x128xf32>
    %c9_95 = arith.constant 9 : index
    %c0_96 = arith.constant 0 : index
    %231 = arith.index_cast %10 : i32 to index
    %c0_97 = arith.constant 0 : index
    %232 = vector.load %arg2[%c9_95, %c0_96, %231, %c0_97] : memref<13x1x8x128xf32, #tpu.memory_space<vmem>>, vector<1x1x8x128xf32>
    %233 = vector.shape_cast %232 : vector<1x1x8x128xf32> to vector<8x128xf32>
    %234 = arith.subf %233, %184 : vector<8x128xf32>
    %235 = math.exp %234 : vector<8x128xf32>
    %236 = arith.addf %225, %235 : vector<8x128xf32>
    %cst_98 = arith.constant 4.000000e+00 : f32
    %237 = vector.broadcast %cst_98 : f32 to vector<8x128xf32>
    %238 = arith.cmpf oeq, %153, %237 : vector<8x128xf32>
    %cst_99 = arith.constant 0.000000e+00 : f32
    %239 = vector.broadcast %cst_99 : f32 to vector<8x128xf32>
    %240 = arith.select %238, %233, %239 : vector<8x128xi1>, vector<8x128xf32>
    %241 = arith.addf %230, %240 : vector<8x128xf32>
    %c10_100 = arith.constant 10 : index
    %c0_101 = arith.constant 0 : index
    %242 = arith.index_cast %10 : i32 to index
    %c0_102 = arith.constant 0 : index
    %243 = vector.load %arg2[%c10_100, %c0_101, %242, %c0_102] : memref<13x1x8x128xf32, #tpu.memory_space<vmem>>, vector<1x1x8x128xf32>
    %244 = vector.shape_cast %243 : vector<1x1x8x128xf32> to vector<8x128xf32>
    %245 = arith.subf %244, %184 : vector<8x128xf32>
    %246 = math.exp %245 : vector<8x128xf32>
    %247 = arith.addf %236, %246 : vector<8x128xf32>
    %cst_103 = arith.constant 5.000000e+00 : f32
    %248 = vector.broadcast %cst_103 : f32 to vector<8x128xf32>
    %249 = arith.cmpf oeq, %153, %248 : vector<8x128xf32>
    %cst_104 = arith.constant 0.000000e+00 : f32
    %250 = vector.broadcast %cst_104 : f32 to vector<8x128xf32>
    %251 = arith.select %249, %244, %250 : vector<8x128xi1>, vector<8x128xf32>
    %252 = arith.addf %241, %251 : vector<8x128xf32>
    %c11_105 = arith.constant 11 : index
    %c0_106 = arith.constant 0 : index
    %253 = arith.index_cast %10 : i32 to index
    %c0_107 = arith.constant 0 : index
    %254 = vector.load %arg2[%c11_105, %c0_106, %253, %c0_107] : memref<13x1x8x128xf32, #tpu.memory_space<vmem>>, vector<1x1x8x128xf32>
    %255 = vector.shape_cast %254 : vector<1x1x8x128xf32> to vector<8x128xf32>
    %256 = arith.subf %255, %184 : vector<8x128xf32>
    %257 = math.exp %256 : vector<8x128xf32>
    %258 = arith.addf %247, %257 : vector<8x128xf32>
    %cst_108 = arith.constant 6.000000e+00 : f32
    %259 = vector.broadcast %cst_108 : f32 to vector<8x128xf32>
    %260 = arith.cmpf oeq, %153, %259 : vector<8x128xf32>
    %cst_109 = arith.constant 0.000000e+00 : f32
    %261 = vector.broadcast %cst_109 : f32 to vector<8x128xf32>
    %262 = arith.select %260, %255, %261 : vector<8x128xi1>, vector<8x128xf32>
    %263 = arith.addf %252, %262 : vector<8x128xf32>
    %c12_110 = arith.constant 12 : index
    %c0_111 = arith.constant 0 : index
    %264 = arith.index_cast %10 : i32 to index
    %c0_112 = arith.constant 0 : index
    %265 = vector.load %arg2[%c12_110, %c0_111, %264, %c0_112] : memref<13x1x8x128xf32, #tpu.memory_space<vmem>>, vector<1x1x8x128xf32>
    %266 = vector.shape_cast %265 : vector<1x1x8x128xf32> to vector<8x128xf32>
    %267 = arith.subf %266, %184 : vector<8x128xf32>
    %268 = math.exp %267 : vector<8x128xf32>
    %269 = arith.addf %258, %268 : vector<8x128xf32>
    %cst_113 = arith.constant 7.000000e+00 : f32
    %270 = vector.broadcast %cst_113 : f32 to vector<8x128xf32>
    %271 = arith.cmpf oeq, %153, %270 : vector<8x128xf32>
    %cst_114 = arith.constant 0.000000e+00 : f32
    %272 = vector.broadcast %cst_114 : f32 to vector<8x128xf32>
    %273 = arith.select %271, %266, %272 : vector<8x128xi1>, vector<8x128xf32>
    %274 = arith.addf %263, %273 : vector<8x128xf32>
    %275 = math.log %269 : vector<8x128xf32>
    %276 = arith.addf %184, %275 : vector<8x128xf32>
    %277 = arith.subf %276, %274 : vector<8x128xf32>
    %278 = arith.mulf %36, %21 : vector<8x128xf32>
    %279 = arith.addf %8, %278 : vector<8x128xf32>
    %280 = arith.addf %8, %21 : vector<8x128xf32>
    %281 = arith.mulf %129, %17 : vector<8x128xf32>
    %282 = arith.addf %8, %281 : vector<8x128xf32>
    %283 = arith.addf %8, %17 : vector<8x128xf32>
    %284 = arith.mulf %150, %17 : vector<8x128xf32>
    %285 = arith.addf %8, %284 : vector<8x128xf32>
    %286 = arith.mulf %277, %17 : vector<8x128xf32>
    %287 = arith.addf %8, %286 : vector<8x128xf32>
    %c1_i32 = arith.constant 1 : i32
    %c0_115 = arith.constant 0 : index
    %c0_116 = arith.constant 0 : index
    %c0_117 = arith.constant 0 : index
    %c0_118 = arith.constant 0 : index
    %288 = vector.load %arg5[%c0_115, %c0_116, %c0_117, %c0_118] : memref<1x1x48x128xf32, #tpu.memory_space<vmem>>, vector<1x1x8x128xf32>
    %289 = vector.shape_cast %288 : vector<1x1x8x128xf32> to vector<8x128xf32>
    %290 = vector.shape_cast %279 : vector<8x128xf32> to vector<1x1x8x128xf32>
    tpu.vector_store %arg5[%c0_115, %c0_116, %c0_117, %c0_118], %290 {strides = array<i32>} : memref<1x1x48x128xf32, #tpu.memory_space<vmem>>, vector<1x1x8x128xf32>,
    %c0_119 = arith.constant 0 : index
    %c0_120 = arith.constant 0 : index
    %c8_121 = arith.constant 8 : index
    %c0_122 = arith.constant 0 : index
    %291 = vector.load %arg5[%c0_119, %c0_120, %c8_121, %c0_122] : memref<1x1x48x128xf32, #tpu.memory_space<vmem>>, vector<1x1x8x128xf32>
    %292 = vector.shape_cast %291 : vector<1x1x8x128xf32> to vector<8x128xf32>
    %293 = vector.shape_cast %280 : vector<8x128xf32> to vector<1x1x8x128xf32>
    tpu.vector_store %arg5[%c0_119, %c0_120, %c8_121, %c0_122], %293 {strides = array<i32>} : memref<1x1x48x128xf32, #tpu.memory_space<vmem>>, vector<1x1x8x128xf32>,
    %c0_123 = arith.constant 0 : index
    %c0_124 = arith.constant 0 : index
    %c16 = arith.constant 16 : index
    %c0_125 = arith.constant 0 : index
    %294 = vector.load %arg5[%c0_123, %c0_124, %c16, %c0_125] : memref<1x1x48x128xf32, #tpu.memory_space<vmem>>, vector<1x1x8x128xf32>
    %295 = vector.shape_cast %294 : vector<1x1x8x128xf32> to vector<8x128xf32>
    %296 = vector.shape_cast %282 : vector<8x128xf32> to vector<1x1x8x128xf32>
    tpu.vector_store %arg5[%c0_123, %c0_124, %c16, %c0_125], %296 {strides = array<i32>} : memref<1x1x48x128xf32, #tpu.memory_space<vmem>>, vector<1x1x8x128xf32>,
    %c0_126 = arith.constant 0 : index
    %c0_127 = arith.constant 0 : index
    %c24 = arith.constant 24 : index
    %c0_128 = arith.constant 0 : index
    %297 = vector.load %arg5[%c0_126, %c0_127, %c24, %c0_128] : memref<1x1x48x128xf32, #tpu.memory_space<vmem>>, vector<1x1x8x128xf32>
    %298 = vector.shape_cast %297 : vector<1x1x8x128xf32> to vector<8x128xf32>
    %299 = vector.shape_cast %283 : vector<8x128xf32> to vector<1x1x8x128xf32>
    tpu.vector_store %arg5[%c0_126, %c0_127, %c24, %c0_128], %299 {strides = array<i32>} : memref<1x1x48x128xf32, #tpu.memory_space<vmem>>, vector<1x1x8x128xf32>,
    %c0_129 = arith.constant 0 : index
    %c0_130 = arith.constant 0 : index
    %c32 = arith.constant 32 : index
    %c0_131 = arith.constant 0 : index
    %300 = vector.load %arg5[%c0_129, %c0_130, %c32, %c0_131] : memref<1x1x48x128xf32, #tpu.memory_space<vmem>>, vector<1x1x8x128xf32>
    %301 = vector.shape_cast %300 : vector<1x1x8x128xf32> to vector<8x128xf32>
    %302 = vector.shape_cast %285 : vector<8x128xf32> to vector<1x1x8x128xf32>
    tpu.vector_store %arg5[%c0_129, %c0_130, %c32, %c0_131], %302 {strides = array<i32>} : memref<1x1x48x128xf32, #tpu.memory_space<vmem>>, vector<1x1x8x128xf32>,
    %c0_132 = arith.constant 0 : index
    %c0_133 = arith.constant 0 : index
    %c40 = arith.constant 40 : index
    %c0_134 = arith.constant 0 : index
    %303 = vector.load %arg5[%c0_132, %c0_133, %c40, %c0_134] : memref<1x1x48x128xf32, #tpu.memory_space<vmem>>, vector<1x1x8x128xf32>
    %304 = vector.shape_cast %303 : vector<1x1x8x128xf32> to vector<8x128xf32>
    %305 = vector.shape_cast %287 : vector<8x128xf32> to vector<1x1x8x128xf32>
    tpu.vector_store %arg5[%c0_132, %c0_133, %c40, %c0_134], %305 {strides = array<i32>} : memref<1x1x48x128xf32, #tpu.memory_space<vmem>>, vector<1x1x8x128xf32>,
    return
  }
  func.func @transform_0(%arg0: i32, %arg1: i32) -> (i32, i32, i32, i32) {
    %c0_i32 = arith.constant 0 : i32
    %c0_i32_0 = arith.constant 0 : i32
    %c0_i32_1 = arith.constant 0 : i32
    return %c0_i32, %arg0, %arg1, %c0_i32_0 : i32, i32, i32, i32
  }
  func.func @transform_1(%arg0: i32, %arg1: i32) -> (i32, i32, i32, i32) {
    %c0_i32 = arith.constant 0 : i32
    %c0_i32_0 = arith.constant 0 : i32
    %c0_i32_1 = arith.constant 0 : i32
    return %c0_i32, %arg0, %arg1, %c0_i32_0 : i32, i32, i32, i32
  }
  func.func @transform_2(%arg0: i32, %arg1: i32) -> (i32, i32, i32) {
    %c0_i32 = arith.constant 0 : i32
    %c0_i32_0 = arith.constant 0 : i32
    %c0_i32_1 = arith.constant 0 : i32
    return %arg0, %c0_i32, %c0_i32_0 : i32, i32, i32
  }
  func.func @transform_3(%arg0: i32, %arg1: i32) -> (i32, i32, i32, i32) {
    %c0_i32 = arith.constant 0 : i32
    %c0_i32_0 = arith.constant 0 : i32
    %c0_i32_1 = arith.constant 0 : i32
    return %arg0, %arg1, %c0_i32, %c0_i32_0 : i32, i32, i32, i32
  }
}

</mosaic_0001>

<bundles_post_ra>
// kernel: yolo_loss.1
= control target key start
LH: loop header
LB: loop body
LE: loop exit
PB: predicated region body
PF: predicated region fallthrough
CT: control target
= control target key end

     0   :  { %s944_s12 = smov 0   ;;  %s946_s13 = smov 0   ;;  %s1178_s0 = inlined_call_operand.vmem [shape: f32[13,3,8,128], index: 0, kind: input, shape index: {}]   ;;  %s1179_s1 = inlined_call_operand.vmem [shape: f32[6,3,8,128], index: 1, kind: input, shape index: {}]   ;;  %s1180_s2 = inlined_call_operand.vmem [shape: f32[3,2,128], index: 2, kind: input, shape index: {}]   ;;  %s1181_s3 = inlined_call_operand.vmem [shape: f32[3,1,48,128], index: 3, kind: output, shape index: {}]  }
   0x1   :  { %s948_s14 = smov 0   ;;  %s950_s15 = smov 0  }
   0x2   :  { %s952_s16 = smov 0  }
   0x3 LB: > { %s25_s17 = sadd.s32 1, %s917_s15  ;;  %p41_p1 = scmp.ne.s32.totalorder %s909_s13, %s905_s12  ;;  %s921_s16 = sphi %s952_s16, %s13_s16   ;;  %s917_s15 = sphi %s950_s15, %s1186_s15   ;;  %s913_s14 = sphi %s948_s14, %s1185_s14   ;;  %s909_s13 = sphi %s946_s13, %s1184_s13   ;;  %s905_s12 = sphi %s944_s12, %s1183_s12  }
   0x4   : > { %p27_p0 = scmp.ge.s32.totalorder %s25_s17, 3  ;;  %p42_p2 = scmp.eq.s32.totalorder %s921_s16, 0 }
   0x5   : > { %s34_s20 = sadd.s32 1, %s909_s13  ;;  %p759_p5 = scmp.ge.s32.totalorder %s921_s16, 3 }
   0x6   : > { %s1188_s17 = smov (%p27_p0, %s25_s17), 0  ;;  %p975_p3 = por %p42_p2, %p41_p1 }
   0x7   : > { %s29_s19 = ssub.s32 %s917_s15, %s1188_s17  ;;  %149 = sbr.rel (%p759_p5) target bundleno = 33 (0x21), region = 16 }
   0x8   : > { %p32_p4 = scmp.eq.s32.totalorder %s29_s19, 0 }
   0xa   : > { %s983_s21 = scalar_select %p32_p4, %s909_s13, %s34_s20  }
   0xe   : > { %152 = sbr.rel (!%p975_p3) target bundleno = 25 (0x19), region = 20  ;;  %s154_s22 = sand.u32 (%p975_p3), 1, %s909_s13  }
   0xf   : > { %s760_s23 = sshll.u32 (%p975_p3), %s917_s15, 3  ;;  %s789_s24 = smul.u32 (%p975_p3), 104, %s154_s22 }
  0x10   : > { %s159_s27 = scalar_lea.vmem (%p975_p3), %s1178_s0, %s760_s23 }
  0x11   : > { %v211_v0 = vld [vmem:[%s159_s27] sm:$0xff] (%p975_p3)  ;;  %v213_v1 = vld [vmem:[%s159_s27 + $0x18] sm:$0xff] (%p975_p3)  ;;  %v215_v2 = vld [vmem:[%s159_s27 + $0x30] sm:$0xff] (%p975_p3)  ;;  %s156_s28 = scalar_lea.vmem (%p975_p3), [#allocation2], %s789_s24 }
  0x12   : > { %v217_v3 = vld [vmem:[%s159_s27 + $0x48] sm:$0xff] (%p975_p3)  ;;  %v219_v4 = vld [vmem:[%s159_s27 + $0x60] sm:$0xff] (%p975_p3)  ;;  %v221_v5 = vld [vmem:[%s159_s27 + $0x78] sm:$0xff] (%p975_p3)  ;;  %212 = vst [vmem:[%s156_s28] sm:$0xff] (%p975_p3), %v211_v0 }
  0x13   : > { %214 = vst [vmem:[%s156_s28 + $0x8] sm:$0xff] (%p975_p3), %v213_v1  ;;  %216 = vst [vmem:[%s156_s28 + $0x10] sm:$0xff] (%p975_p3), %v215_v2  ;;  %v223_v6 = vld [vmem:[%s159_s27 + $0x90] sm:$0xff] (%p975_p3)  ;;  %v225_v7 = vld [vmem:[%s159_s27 + $0xa8] sm:$0xff] (%p975_p3) }
  0x14   : > { %218 = vst [vmem:[%s156_s28 + $0x18] sm:$0xff] (%p975_p3), %v217_v3  ;;  %220 = vst [vmem:[%s156_s28 + $0x20] sm:$0xff] (%p975_p3), %v219_v4  ;;  %v227_v8 = vld [vmem:[%s159_s27 + $0xc0] sm:$0xff] (%p975_p3)  ;;  %v229_v9 = vld [vmem:[%s159_s27 + $0xd8] sm:$0xff] (%p975_p3) }
  0x15   : > { %222 = vst [vmem:[%s156_s28 + $0x28] sm:$0xff] %v221_v5  ;;  %224 = vst [vmem:[%s156_s28 + $0x30] sm:$0xff] %v223_v6  ;;  %v231_v10 = vld [vmem:[%s159_s27 + $0xf0] sm:$0xff]  ;;  %v233_v11 = vld [vmem:[%s159_s27 + $0x108] sm:$0xff] }
  0x16   : > { %226 = vst [vmem:[%s156_s28 + $0x38] sm:$0xff] %v225_v7  ;;  %228 = vst [vmem:[%s156_s28 + $0x40] sm:$0xff] %v227_v8  ;;  %v235_v12 = vld [vmem:[%s159_s27 + $0x120] sm:$0xff] }
  0x17   : > { %230 = vst [vmem:[%s156_s28 + $0x48] sm:$0xff] %v229_v9  ;;  %232 = vst [vmem:[%s156_s28 + $0x50] sm:$0xff] %v231_v10 }
  0x18   : > { %234 = vst [vmem:[%s156_s28 + $0x58] sm:$0xff] %v233_v11  ;;  %236 = vst [vmem:[%s156_s28 + $0x60] sm:$0xff] %v235_v12 }
  0x19 PF: > { %242 = sbr.rel (!%p975_p3) target bundleno = 33 (0x21), region = 58  ;;  %s244_s29 = sand.u32 (%p975_p3), 1, %s909_s13  }
  0x1a   : > { %s761_s30 = sshll.u32 (%p975_p3), %s917_s15, 3  ;;  %s790_s4 = smul.u32 (%p975_p3), 48, %s244_s29 }
  0x1b   : > { %s249_s7 = scalar_lea.vmem (%p975_p3), %s1179_s1, %s761_s30 }
  0x1c   : > { %v287_v13 = vld [vmem:[%s249_s7] sm:$0xff] (%p975_p3)  ;;  %v289_v14 = vld [vmem:[%s249_s7 + $0x18] sm:$0xff] (%p975_p3)  ;;  %v291_v15 = vld [vmem:[%s249_s7 + $0x30] sm:$0xff] (%p975_p3)  ;;  %s246_s8 = scalar_lea.vmem (%p975_p3), [#allocation3], %s790_s4 }
  0x1d   : > { %v293_v16 = vld [vmem:[%s249_s7 + $0x48] sm:$0xff] (%p975_p3)  ;;  %v295_v17 = vld [vmem:[%s249_s7 + $0x60] sm:$0xff] (%p975_p3)  ;;  %v297_v18 = vld [vmem:[%s249_s7 + $0x78] sm:$0xff] (%p975_p3)  ;;  %288 = vst [vmem:[%s246_s8] sm:$0xff] (%p975_p3), %v287_v13 }
  0x1e   : > { %290 = vst [vmem:[%s246_s8 + $0x8] sm:$0xff] (%p975_p3), %v289_v14  ;;  %292 = vst [vmem:[%s246_s8 + $0x10] sm:$0xff] (%p975_p3), %v291_v15 }
  0x1f   : > { %294 = vst [vmem:[%s246_s8 + $0x18] sm:$0xff] (%p975_p3), %v293_v16  ;;  %296 = vst [vmem:[%s246_s8 + $0x20] sm:$0xff] (%p975_p3), %v295_v17 }
  0x20   : > { %298 = vst [vmem:[%s246_s8 + $0x28] sm:$0xff] %v297_v18 }
  0x21 PF: > { %p762_p6 = scmp.ge.s32.totalorder %s921_s16, 1  ;;  %p310_p7 = scmp.lt.s32.totalorder %s921_s16, 4 }
  0x23   : > { %p311_p8 = pnand %p762_p6, %p310_p7 }
  0x24   : > { %s317_s9 = sand.u32 (!%p311_p8), 1, %s905_s12   ;;  %p359_p9 = scmp.lt.s32.totalorder (!%p311_p8), %s913_s14, 2  ;;  %v923_v27 = vmov (!%p311_p8), 0.0   ;;  %v423_v34 = vlaneseq (!%p311_p8) }
  0x25   : > { %314 = sbr.rel (%p311_p8) target bundleno = 114 (0x72), region = 100 }
  0x26   : > { %s791_s10 = smul.u32 (!%p311_p8), 104, %s317_s9  ;;  %v424_v43 = vshrl.u32 (!%p311_p8), %v423_v34, 7 }
  0x27   : > { %s792_s11 = smul.u32 (!%p311_p8), 48, %s317_s9 }
  0x28   : > { %s1004_s18 = scalar_lea.vmem (!%p311_p8), [#allocation2], %s791_s10  ;;  %v425_v49 = vsub.s32 (!%p311_p8), 0, %v424_v43 }
  0x29   : > { %v1007_v19 = vld [vmem:[%s1004_s18] sm:$0xff] (!%p311_p8)  ;;  %s1010_s19 = scalar_lea.vmem (!%p311_p8), [#allocation3], %s792_s11  ;;  %v1022_v23 = vld [vmem:[%s1004_s18 + $0x18] sm:$0xff] (!%p311_p8)  ;;  %v767_v24 = vld [vmem:[%s1004_s18 + $0x8] sm:$0xff] (!%p311_p8) }
  0x2a   : > { %v1013_v20 = vld [vmem:[%s1010_s19] sm:$0xff] (!%p311_p8)  ;;  %v389_v21 = vand.u32 (!%p311_p8), 2147483647, %v1007_v19  ;;  %v1045_v32 = vld [vmem:[%s1004_s18 + $0x28] sm:$0xff] (!%p311_p8)  ;;  %v768_v35 = vmul.f32 (!%p311_p8), -1.442695, %v767_v24 }
  0x2b   : > { %vm379_vm0 = vcmp.eq.f32.partialorder (!%p311_p8), %v1013_v20, 1.0  ;;  %vm382_vm1 = vcmp.eq.f32.partialorder (!%p311_p8), %v1013_v20, 0.0  ;;  %v769_v25 = vld [vmem:[%s1004_s18 + $0x10] sm:$0xff] (!%p311_p8)  ;;  %v1052_v36 = vld [vmem:[%s1004_s18 + $0x38] sm:$0xff] (!%p311_p8)  ;;  %v1055_v37 = vld [vmem:[%s1004_s18 + $0x20] sm:$0xff] (!%p311_p8)  ;;  %v386_v52 = vmax.f32 (!%p311_p8), %v1007_v19, 0.0  ;;  %v387_v53 = vmul.f32 (!%p311_p8), %v1007_v19, %v1013_v20 }
  0x2c   : > { %s1190_s14 = smov (!%p359_p9, %s913_s14), 2  ;;  %v390_v22 = vsub.f32 0.0, %v389_v21  ;;  %v1033_v28 = vsel %vm379_vm0, 1.0, %v923_v27  ;;  %v1035_v29 = vsel %vm382_vm1, 1.0, %v923_v27  ;;  %v1048_v33 = vld [vmem:[%s1004_s18 + $0x30] sm:$0xff]  ;;  %v1061_v41 = vld [vmem:[%s1004_s18 + $0x40] sm:$0xff] }
  0x2d   : > { %s763_s12 = sshll.u32 %s1190_s14, 1  ;;  %s793_s20 = smul.u32 48, %s1190_s14  ;;  %v770_v38 = vmul.f32 -1.442695, %v769_v25  ;;  %v517_v39 = vmax.f32 %v1045_v32, %v1048_v33  ;;  %v421_v40 = vmul.f32 1.442695, %v1022_v23  ;;  %v1086_v1 = vsub.f32 %v386_v52, %v387_v53 }
  0x2e   : > { %s362_s24 = scalar_lea.vmem %s1180_s2, %s763_s12  ;;  %v391_v30 = vmul.f32 1.442695, %v390_v22  ;;  %v428_v44 = vmul.f32 1.442695, %v1055_v37  ;;  %v1066_v45 = vld [vmem:[%s1004_s18 + $0x48] sm:$0xff]  ;;  %v1070_v47 = vld [vmem:[%s1004_s18 + $0x50] sm:$0xff] }
  0x2f   : > { %s1029_s27 = scalar_lea.vmem %s1181_s3, %s793_s20  ;;  %v1031_v26 = vld [vmem:[%s362_s24] sm:$0x1]  ;;  %v1037_v31 = vld [vmem:[%s362_s24 + $0x1] sm:$0x1]  ;;  %v521_v42 = vmax.f32 %v517_v39, %v1052_v36  ;;  %v775_v59 = vld [vmem:[%s1010_s19 + $0x18] sm:$0xff] }
  0x30   : > { %835 = vrcp.f32 %v1031_v26  ;;  %613 = vst [vmem:[%s1029_s27 + $0x8] sm:$0xff] %v1035_v29  ;;  %615 = vst [vmem:[%s1029_s27 + $0x18] sm:$0xff] %v1033_v28  ;;  %v1074_v50 = vld [vmem:[%s1004_s18 + $0x58] sm:$0xff]  ;;  %v1081_v57 = vld [vmem:[%s1004_s18 + $0x60] sm:$0xff]  ;;  %v426_v5 = vrot.slane %v1031_v26, %v425_v49  ;;  %v777_v6 = vmul.f32 -1.442695, %v1007_v19  ;;  %v433_v9 = vrot.slane %v1037_v31, %v425_v49 }
  0x31   : > { %837 = vrcp.f32 %v1037_v31  ;;  %v525_v46 = vmax.f32 %v521_v42, %v1061_v41  ;;  %v776_v63 = vld [vmem:[%s1010_s19 + $0x20] sm:$0xff]  ;;  %v1096_v11 = vmul.f32 0.5, %v775_v59  ;;  %v773_v24 = vld [vmem:[%s1010_s19 + $0x8] sm:$0xff]  ;;  %v774_v43 = vld [vmem:[%s1010_s19 + $0x10] sm:$0xff] }
  0x32   : > { %839 = vpow2.f32 %v391_v30  ;;  %v1093_v7 = vmul.f32 %v776_v63, %v775_v59  ;;  %v1102_v18 = vmul.f32 0.5, %v776_v63  ;;  %v1110_v25 = vld [vmem:[%s1010_s19 + $0x28] sm:$0xff] }
  0x33   : > { %841 = vpow2.f32 %v768_v35  ;;  %v529_v48 = vmax.f32 %v525_v46, %v1066_v45  ;;  %vm546_vm2 = vcmp.eq.f32.partialorder %v1110_v25, 0.0  ;;  %v449_v46 = vsub.f32 %v773_v24, %v1096_v11 }
  0x34   : > { %843 = vpow2.f32 %v770_v38  ;;  %v467_v34 = vand.u32 2147483647, %v1093_v7  ;;  %vm553_vm3 = vcmp.eq.f32.partialorder %v1110_v25, 1.0  ;;  %vm560_vm4 = vcmp.eq.f32.partialorder %v1110_v25, 2.0 }
  0x35   : > { %845 = vpow2.f32 %v421_v40  ;;  %v533_v54 = vmax.f32 %v529_v48, %v1070_v47  ;;  %vm567_vm5 = vcmp.eq.f32.partialorder %v1110_v25, 3.0  ;;  %vm574_vm6 = vcmp.eq.f32.partialorder %v1110_v25, 4.0 }
  0x36   : > { %847 = vpow2.f32 %v428_v44  ;;  %v446_v44 = vadd.f32 %v773_v24, %v1096_v11  ;;  %vm581_vm7 = vcmp.eq.f32.partialorder %v1110_v25, 5.0  ;;  %vm588_vm8 = vcmp.eq.f32.partialorder %v1110_v25, 6.0 }
  0x37   : > { %v537_v61 = vmax.f32 %v533_v54, %v1074_v50  ;;  %vm595_vm9 = vcmp.eq.f32.partialorder %v1110_v25, 7.0 }
  0x39   : > { %v1089_v3 = vmax.f32 %v537_v61, %v1081_v57  ;;  %v547_v61 = vsel %vm546_vm2, %v1045_v32, 0.0 }
  0x3a   : > { %v836_v51 = vpop.eup %835 }
  0x3b   : > { %v838_v55 = vpop.eup %837  ;;  %v485_v56 = vrot.slane %v836_v51, %v425_v49  ;;  %v542_v16 = vsub.f32 %v1045_v32, %v1089_v3  ;;  %v549_v17 = vsub.f32 %v1048_v33, %v1089_v3  ;;  %v556_v19 = vsub.f32 %v1052_v36, %v1089_v3 }
  0x3c   : > { %v840_v58 = vpop.eup %839  ;;  %v493_v60 = vrot.slane %v838_v55, %v425_v49  ;;  %v563_v21 = vsub.f32 %v1061_v41, %v1089_v3  ;;  %v570_v30 = vsub.f32 %v1066_v45, %v1089_v3  ;;  %v577_v39 = vsub.f32 %v1070_v47, %v1089_v3 }
  0x3d   : > { %v393_v62 = vadd.f32 1.0, %v840_v58  ;;  %v486_v0 = vmul.f32 %v775_v59, %v485_v56  ;;  %v842_v4 = vpop.eup %841  ;;  %v543_v26 = vmul.f32 1.442695, %v542_v16  ;;  %v550_v27 = vmul.f32 1.442695, %v549_v17 }
  0x3e   : > { %v494_v2 = vmul.f32 %v776_v63, %v493_v60  ;;  %v844_v8 = vpop.eup %843  ;;  %v403_v10 = vadd.f32 1.0, %v842_v4  ;;  %v557_v35 = vmul.f32 1.442695, %v556_v19  ;;  %v564_v38 = vmul.f32 1.442695, %v563_v21 }
  0x3f   : > { %849 = vlog2.f32 %v393_v62  ;;  %v487_v12 = vadd.f32 1e-16, %v486_v0  ;;  %v846_v13 = vpop.eup %845  ;;  %v412_v14 = vadd.f32 1.0, %v844_v8  ;;  %v584_v40 = vsub.f32 %v1074_v50, %v1089_v3 }
  0x40   : > { %v495_v15 = vadd.f32 1e-16, %v494_v2  ;;  %851 = vrcp.f32 %v403_v10  ;;  %v848_v22 = vpop.eup %847  ;;  %v427_v31 = vmul.f32 %v846_v13, %v426_v5  ;;  %v571_v48 = vmul.f32 1.442695, %v570_v30 }
  0x41   : > { %853 = vrcp.f32 %v412_v14  ;;  %v434_v42 = vmul.f32 %v848_v22, %v433_v9  ;;  %v578_v51 = vmul.f32 1.442695, %v577_v39  ;;  %v591_v52 = vsub.f32 %v1081_v57, %v1089_v3 }
  0x42   : > { %855 = vlog2.f32 %v487_v12  ;;  %v443_v54 = vmul.f32 0.5, %v427_v31  ;;  %v456_v55 = vadd.f32 %v774_v43, %v1102_v18  ;;  %v585_v56 = vmul.f32 1.442695, %v584_v40 }
  0x43   : > { %857 = vlog2.f32 %v495_v15  ;;  %v464_v49 = vmul.f32 %v434_v42, %v427_v31  ;;  %v453_v59 = vmul.f32 0.5, %v434_v42  ;;  %v459_v60 = vsub.f32 %v774_v43, %v1102_v18 }
  0x44   : > { %859 = vpow2.f32 %v543_v26  ;;  %v554_v62 = vsel %vm553_vm3, %v1048_v33, 0.0  ;;  %v592_v4 = vmul.f32 1.442695, %v591_v52 }
  0x45   : > { %861 = vpow2.f32 %v550_v27  ;;  %v465_v2 = vand.u32 2147483647, %v464_v49 }
  0x46   : > { %863 = vpow2.f32 %v557_v35 }
  0x47   : > { %865 = vpow2.f32 %v564_v38 }
  0x48   : > { %867 = vpow2.f32 %v777_v6 }
  0x49   : > { %v850_v53 = vpop.eup %849  ;;  %869 = vpow2.f32 %v571_v48 }
  0x4a   : > { %v395_v58 = vmul.f32 0.6931472, %v850_v53  ;;  %v852_v63 = vpop.eup %851  ;;  %871 = vpow2.f32 %v578_v51 }
  0x4b   : > { %v854_v5 = vpop.eup %853  ;;  %v444_v6 = vadd.f32 %v852_v63, %v443_v54  ;;  %v448_v8 = vsub.f32 %v852_v63, %v443_v54  ;;  %v498_v9 = vsub.f32 %v852_v63, %v773_v24  ;;  %873 = vpow2.f32 %v585_v56 }
  0x4c   : > { %v396_v0 = vadd.f32 %v395_v58, %v1086_v1  ;;  %v856_v32 = vpop.eup %855  ;;  %v454_v11 = vadd.f32 %v854_v5, %v453_v59  ;;  %v458_v33 = vsub.f32 %v854_v5, %v453_v59  ;;  %v500_v12 = vsub.f32 %v854_v5, %v774_v43 }
  0x4d   : > { %v858_v13 = vpop.eup %857  ;;  %v447_v14 = vmin.f32 %v444_v6, %v446_v44  ;;  %v450_v15 = vmax.f32 %v448_v8, %v449_v46  ;;  %v489_v16 = vmul.f32 0.6931472, %v856_v32  ;;  %v499_v1 = vmul.f32 %v498_v9, %v498_v9 }
  0x4e   : > { %v602_v10 = vmul.f32 %v1035_v29, %v396_v0  ;;  %v860_v17 = vpop.eup %859  ;;  %v457_v18 = vmin.f32 %v454_v11, %v456_v55  ;;  %v460_v19 = vmax.f32 %v458_v33, %v459_v60  ;;  %v497_v21 = vmul.f32 0.6931472, %v858_v13 }
  0x4f   : > { %v501_v22 = vmul.f32 %v500_v12, %v500_v12  ;;  %v862_v26 = vpop.eup %861  ;;  %v451_v24 = vsub.f32 %v447_v14, %v450_v15  ;;  %v503_v27 = vsub.f32 %v1022_v23, %v489_v16  ;;  %875 = vpow2.f32 %v592_v4 }
  0x50   : > { %612 = vst [vmem:[%s1029_s27] sm:$0xff] %v602_v10  ;;  %v864_v29 = vpop.eup %863  ;;  %v461_v30 = vsub.f32 %v457_v18, %v460_v19  ;;  %v506_v35 = vsub.f32 %v1055_v37, %v497_v21  ;;  %v552_v38 = vadd.f32 %v862_v26, %v860_v17  ;;  %v555_v43 = vadd.f32 %v554_v62, %v547_v61 }
  0x51   : > { %v502_v31 = vadd.f32 %v501_v22, %v499_v1  ;;  %v866_v39 = vpop.eup %865  ;;  %v452_v40 = vmax.f32 %v451_v24, 0.0  ;;  %v504_v42 = vmul.f32 %v503_v27, %v503_v27  ;;  %v561_v44 = vsel %vm560_vm4, %v1052_v36, 0.0 }
  0x52   : > { %v868_v46 = vpop.eup %867  ;;  %v462_v48 = vmax.f32 %v461_v30, 0.0  ;;  %v468_v23 = vadd.f32 %v467_v34, %v465_v2  ;;  %v507_v49 = vmul.f32 %v506_v35, %v506_v35  ;;  %v559_v51 = vadd.f32 %v864_v29, %v552_v38 }
  0x53   : > { %v870_v52 = vpop.eup %869  ;;  %v505_v53 = vadd.f32 %v504_v42, %v502_v31  ;;  %v562_v59 = vadd.f32 %v561_v44, %v555_v43  ;;  %v568_v36 = vsel %vm567_vm5, %v1061_v41, 0.0  ;;  %v476_v62 = vadd.f32 1.0, %v868_v46 }
  0x54   : > { %v872_v37 = vpop.eup %871  ;;  %v463_v54 = vmul.f32 %v462_v48, %v452_v40  ;;  %v566_v55 = vadd.f32 %v866_v39, %v559_v51  ;;  %v575_v4 = vsel %vm574_vm6, %v1066_v45, 0.0  ;;  %v582_v8 = vsel %vm581_vm7, %v1070_v47, 0.0 }
  0x55   : > { %v874_v56 = vpop.eup %873  ;;  %v508_v58 = vadd.f32 %v507_v49, %v505_v53  ;;  %v569_v2 = vadd.f32 %v568_v36, %v562_v59  ;;  %v589_v32 = vsel %vm588_vm8, %v1074_v50, 0.0  ;;  %v596_v12 = vsel %vm595_vm9, %v1081_v57, 0.0 }
  0x56   : > { %v469_v60 = vsub.f32 %v468_v23, %v463_v54  ;;  %v573_v61 = vadd.f32 %v870_v52, %v566_v55 }
  0x57   : > { %v608_v7 = vmul.f32 %v1033_v28, %v508_v58  ;;  %v576_v41 = vadd.f32 %v575_v4, %v569_v2 }
  0x58   : > { %v470_v34 = vadd.f32 1e-06, %v469_v60  ;;  %v580_v63 = vadd.f32 %v872_v37, %v573_v61 }
  0x59   : > { %v876_v0 = vpop.eup %875  ;;  %616 = vst [vmem:[%s1029_s27 + $0x20] sm:$0xff] %v608_v7  ;;  %v583_v9 = vadd.f32 %v582_v8, %v576_v41 }
  0x5a   : > { %877 = vrcp.f32 %v470_v34  ;;  %v587_v5 = vadd.f32 %v874_v56, %v580_v63 }
  0x5b   : > { %879 = vrcp.f32 %v476_v62  ;;  %v590_v11 = vadd.f32 %v589_v32, %v583_v9 }
  0x5c   : > { %v594_v6 = vadd.f32 %v876_v0, %v587_v5 }
  0x5d   : > { %v597_v15 = vadd.f32 %v596_v12, %v590_v11 }
  0x5e   : > { %881 = vlog2.f32 %v594_v6 }
  0x64   : > { %v878_v10 = vpop.eup %877 }
  0x65   : > { %v472_v45 = vmul.f32 %v878_v10, %v463_v54  ;;  %v880_v33 = vpop.eup %879 }
  0x67   : > { %v479_v13 = vmul.f32 %v472_v45, %v1013_v20 }
  0x68   : > { %v882_v14 = vpop.eup %881 }
  0x69   : > { %v480_v47 = vsub.f32 %v880_v33, %v479_v13  ;;  %v599_v16 = vmul.f32 0.6931472, %v882_v14 }
  0x6b   : > { %v481_v1 = vmul.f32 %v480_v47, %v480_v47  ;;  %v600_v17 = vadd.f32 %v599_v16, %v1089_v3 }
  0x6d   : > { %v605_v50 = vmul.f32 %v1033_v28, %v481_v1  ;;  %v601_v18 = vsub.f32 %v600_v17, %v597_v15 }
  0x6f   : > { %614 = vst [vmem:[%s1029_s27 + $0x10] sm:$0xff] %v605_v50  ;;  %v610_v25 = vmul.f32 %v1033_v28, %v601_v18 }
  0x71   : > { %617 = vst [vmem:[%s1029_s27 + $0x28] sm:$0xff] %v610_v25 }
  0x72 PF: > { %s13_s16 = sadd.s32 1, %s921_s16   ;;  %s1183_s12 = smov %s909_s13 }
  0x73   : > { %p10_p10 = scmp.ge.s32.totalorder %s13_s16, 5   ;;  %s1184_s13 = smov %s983_s21 }
  0x74   : > { %s1185_s14 = smov %s917_s15  ;;  %s1186_s15 = smov %s1188_s17 }
  0x75   :  { %12 = sbr.rel (!%p10_p10) target bundleno = 3 (0x3), region = 171 }

</bundles_post_ra>
